<compile_context>
chip_gen: v5e
topology: v5e:2x2
jax: 0.10.0
libtpu: 0.0.40
codegen_flags: <defaults>
</compile_context>

<pallas_src>
import jax
import jax.numpy as jnp
from jax.experimental import pallas as pl
from jax.experimental.pallas import tpu as pltpu


_NEG_BIG = -1e30  # bias for padded softmax columns -> exp(.) == 0


def classifier_kernel(x_ref, w1_ref, b1_ref, w2_ref, b2_ref, o_ref):
    # x: (TB, D) bf16 | w1: (D, H) bf16 | b1: (1, H) f32
    # w2: (H, Op) bf16 | b2: (1, Op) f32 | o: (TB, Op) f32
    x = x_ref[...]

    # Linear(latent_dim -> 32): bf16 MXU matmul, f32 accumulation.
    h = jnp.dot(x, w1_ref[...], preferred_element_type=jnp.float32) + b1_ref[...]

    # LeakyReLU (default negative_slope = 0.01), f32 on the VPU.
    h = jnp.where(h > 0, h, 0.01 * h)

    # Dropout(0.25): identity in eval mode.
    # TODO(synk): train-mode dropout (pltpu.prng_random_bits mask) not emitted.

    # Linear(32 -> output_dim_padded). Padded w2 columns are zero and their bias
    # is -1e30, so they contribute exp(.) == 0 below.
    logits = jnp.dot(h.astype(w2_ref.dtype), w2_ref[...],
                     preferred_element_type=jnp.float32) + b2_ref[...]

    # Softmax along dim=1 (lane axis), numerically stabilized, f32 math.
    m = jnp.max(logits, axis=-1, keepdims=True)
    e = jnp.exp(logits - m)
    denom = jnp.sum(e, axis=-1, keepdims=True)
    o_ref[...] = (e * pl.reciprocal(denom, approx=True)).astype(o_ref.dtype)


def _round_up(n, m):
    return (n + m - 1) // m * m


def classifier_forward(x, w1, b1, w2, b2, *, block_rows=1024):
    """x:(B,D), w1:(D,H), b1:(H,)|(1,H), w2:(H,O), b2:(O,)|(1,O) -> (B,O) f32."""
    B, D = x.shape
    H = w1.shape[1]
    O = w2.shape[1]

    # Lane-dense output: pad the class axis to a multiple of 128 lanes.
    O_pad = _round_up(O, 128)
    # Batch tiling: large tiles amortize the ~0.35us/step overhead; per-tile
    # VMEM footprint stays tiny (<1 MiB) so this is safe on v7x's 64 MiB VMEM.
    TB = min(block_rows, _round_up(B, 8))
    B_pad = _round_up(B, TB)

    # Stream activations & weights in bf16 (mem-bound); biases stay f32.
    x_p = jnp.zeros((B_pad, D), jnp.bfloat16).at[:B, :].set(x.astype(jnp.bfloat16))
    w1_c = w1.astype(jnp.bfloat16)
    b1_c = jnp.reshape(b1, (1, H)).astype(jnp.float32)
    w2_p = jnp.zeros((H, O_pad), jnp.bfloat16).at[:, :O].set(w2.astype(jnp.bfloat16))
    b2_p = jnp.full((1, O_pad), _NEG_BIG, jnp.float32).at[0, :O].set(
        jnp.reshape(b2, (O,)).astype(jnp.float32))

    grid = (B_pad // TB,)

    flops = 2 * B_pad * (D * H + H * O_pad)
    bytes_accessed = (x_p.size * 2 + w1_c.size * 2 + w2_p.size * 2
                      + b1_c.size * 4 + b2_p.size * 4 + B_pad * O_pad * 4)

    out_padded = pl.pallas_call(
        classifier_kernel,
        out_shape=jax.ShapeDtypeStruct((B_pad, O_pad), jnp.float32),
        grid=grid,
        in_specs=[
            pl.BlockSpec((TB, D), lambda i: (i, 0)),        # x tile, streamed
            pl.BlockSpec((D, H), lambda i: (0, 0)),         # w1, VMEM-resident
            pl.BlockSpec((1, H), lambda i: (0, 0)),         # b1
            pl.BlockSpec((H, O_pad), lambda i: (0, 0)),     # w2 (padded)
            pl.BlockSpec((1, O_pad), lambda i: (0, 0)),     # b2 (padded)
        ],
        out_specs=pl.BlockSpec((TB, O_pad), lambda i: (i, 0)),
        compiler_params=pltpu.CompilerParams(
            dimension_semantics=("parallel",)),
        cost_estimate=pl.CostEstimate(
            flops=flops,
            transcendentals=B_pad * O_pad,
            bytes_accessed=bytes_accessed),
    )(x_p, w1_c, b1_c, w2_p, b2_p)

    return out_padded[:B, :O]


def init_params(key, latent_dim, hidden, output_dim):
    # Deterministic synthetic init (uniform, PyTorch-Linear-like fan_in bound).
    k1, k2, k3, k4 = jax.random.split(key, 4)
    bound1 = 1.0 / (latent_dim ** 0.5)
    bound2 = 1.0 / (hidden ** 0.5)
    w1 = jax.random.uniform(k1, (latent_dim, hidden), jnp.float32, -bound1, bound1)
    b1 = jax.random.uniform(k2, (1, hidden), jnp.float32, -bound1, bound1)
    w2 = jax.random.uniform(k3, (hidden, output_dim), jnp.float32, -bound2, bound2)
    b2 = jax.random.uniform(k4, (1, output_dim), jnp.float32, -bound2, bound2)
    return w1, b1, w2, b2


if __name__ == "__main__":
    batch = 8
    latent_dim = 16
    hidden = 32
    output_dim = 8

    key = jax.random.PRNGKey(0)
    kx, kp = jax.random.split(key)
    x = jax.random.normal(kx, (batch, latent_dim), dtype=jnp.float32)
    w1, b1, w2, b2 = init_params(kp, latent_dim, hidden, output_dim)

    out = classifier_forward(x, w1, b1, w2, b2)
    out = jax.block_until_ready(out)

    # Reference: same bf16 quantization of the streamed operands, f32 math.
    xq = x.astype(jnp.bfloat16).astype(jnp.float32)
    w1q = w1.astype(jnp.bfloat16).astype(jnp.float32)
    w2q = w2.astype(jnp.bfloat16).astype(jnp.float32)
    h_ref = xq @ w1q + b1
    h_ref = jnp.where(h_ref > 0, h_ref, 0.01 * h_ref)
    h_ref = h_ref.astype(jnp.bfloat16).astype(jnp.float32)
    logits_ref = h_ref @ w2q + b2
    ref = jax.nn.softmax(logits_ref, axis=1)

    assert out.shape == (batch, output_dim)
    # approx=True reciprocal makes row sums == 1 only to ~1e-3.
    assert jnp.allclose(jnp.sum(out, axis=1), 1.0, atol=5e-3)
    assert jnp.allclose(out, ref, atol=5e-3)

    print("KERNEL_OK")
</pallas_src>

<mosaic_0001>
module attributes {stable_mosaic.version = 11 : i64} {
  func.func @classifier_kernel(%arg0: i32, %arg1: memref<8x16xbf16, #tpu.memory_space<vmem>>, %arg2: memref<16x32xbf16, #tpu.memory_space<vmem>>, %arg3: memref<1x32xf32, #tpu.memory_space<vmem>>, %arg4: memref<32x128xbf16, #tpu.memory_space<vmem>>, %arg5: memref<1x128xf32, #tpu.memory_space<vmem>>, %arg6: memref<8x128xf32, #tpu.memory_space<vmem>>) attributes {dimension_semantics = [#tpu.dimension_semantics<parallel>], iteration_bounds = array<i64: 1>, scalar_prefetch = 0 : i64, scratch_operands = 0 : i64, tpu.core_type = #tpu.core_type<tc>, window_params = [{transform_indices = @transform_0, window_bounds = array<i64: 8, 16>}, {pipeline_mode = #tpu.pipeline_mode<synchronous>, transform_indices = @transform_1, window_bounds = array<i64: 16, 32>}, {pipeline_mode = #tpu.pipeline_mode<synchronous>, transform_indices = @transform_2, window_bounds = array<i64: 1, 32>}, {pipeline_mode = #tpu.pipeline_mode<synchronous>, transform_indices = @transform_3, window_bounds = array<i64: 32, 128>}, {pipeline_mode = #tpu.pipeline_mode<synchronous>, transform_indices = @transform_4, window_bounds = array<i64: 1, 128>}, {transform_indices = @transform_5, window_bounds = array<i64: 8, 128>}]} {
    %c0 = arith.constant 0 : index
    %c0_0 = arith.constant 0 : index
    %0 = vector.load %arg1[%c0, %c0_0] : memref<8x16xbf16, #tpu.memory_space<vmem>>, vector<8x16xbf16>
    %c0_1 = arith.constant 0 : index
    %c0_2 = arith.constant 0 : index
    %1 = vector.load %arg2[%c0_1, %c0_2] : memref<16x32xbf16, #tpu.memory_space<vmem>>, vector<16x32xbf16>
    %cst = arith.constant dense<0.000000e+00> : vector<8x32xf32>
    %2 = tpu.matmul %0, %1, %cst {dimension_numbers = #tpu.dot_dimension_numbers<[1], [0], [0], [1], [0, 0, 1, 1], [], []>} : vector<8x16xbf16>, vector<16x32xbf16>, vector<8x32xf32> -> vector<8x32xf32>
    %c0_3 = arith.constant 0 : index
    %c0_4 = arith.constant 0 : index
    %3 = vector.load %arg3[%c0_3, %c0_4] : memref<1x32xf32, #tpu.memory_space<vmem>>, vector<1x32xf32>
    %4 = vector.broadcast %3 : vector<1x32xf32> to vector<8x32xf32>
    %5 = arith.addf %2, %4 : vector<8x32xf32>
    %cst_5 = arith.constant 0.000000e+00 : f32
    %6 = vector.broadcast %cst_5 : f32 to vector<8x32xf32>
    %7 = arith.cmpf ogt, %5, %6 : vector<8x32xf32>
    %cst_6 = arith.constant 0.00999999977 : f32
    %8 = vector.broadcast %cst_6 : f32 to vector<8x32xf32>
    %9 = arith.mulf %8, %5 : vector<8x32xf32>
    %10 = arith.select %7, %5, %9 : vector<8x32xi1>, vector<8x32xf32>
    %11 = arith.truncf %10 : vector<8x32xf32> to vector<8x32xbf16>
    %c0_7 = arith.constant 0 : index
    %c0_8 = arith.constant 0 : index
    %12 = vector.load %arg4[%c0_7, %c0_8] : memref<32x128xbf16, #tpu.memory_space<vmem>>, vector<32x128xbf16>
    %cst_9 = arith.constant dense<0.000000e+00> : vector<8x128xf32>
    %13 = tpu.matmul %11, %12, %cst_9 {dimension_numbers = #tpu.dot_dimension_numbers<[1], [0], [0], [1], [0, 0, 1, 1], [], []>} : vector<8x32xbf16>, vector<32x128xbf16>, vector<8x128xf32> -> vector<8x128xf32>
    %c0_10 = arith.constant 0 : index
    %c0_11 = arith.constant 0 : index
    %14 = vector.load %arg5[%c0_10, %c0_11] : memref<1x128xf32, #tpu.memory_space<vmem>>, vector<1x128xf32>
    %15 = vector.broadcast %14 : vector<1x128xf32> to vector<8x128xf32>
    %16 = arith.addf %13, %15 : vector<8x128xf32>
    %cst_12 = arith.constant dense<0xFF800000> : vector<8xf32>
    %17 = vector.multi_reduction <maximumf>, %16, %cst_12 [1] : vector<8x128xf32> to vector<8xf32>
    %18 = vector.shape_cast %17 : vector<8xf32> to vector<8x1xf32>
    %19 = vector.broadcast %18 : vector<8x1xf32> to vector<8x128xf32>
    %20 = arith.subf %16, %19 : vector<8x128xf32>
    %21 = math.exp %20 : vector<8x128xf32>
    %cst_13 = arith.constant dense<0.000000e+00> : vector<8xf32>
    %22 = vector.multi_reduction <add>, %21, %cst_13 [1] : vector<8x128xf32> to vector<8xf32>
    %23 = vector.shape_cast %22 : vector<8xf32> to vector<8x1xf32>
    %24 = tpu.reciprocal %23 {approx = true} : vector<8x1xf32> -> vector<8x1xf32>
    %25 = vector.broadcast %24 : vector<8x1xf32> to vector<8x128xf32>
    %26 = arith.mulf %21, %25 : vector<8x128xf32>
    %c0_14 = arith.constant 0 : index
    %c0_15 = arith.constant 0 : index
    %27 = vector.load %arg6[%c0_14, %c0_15] : memref<8x128xf32, #tpu.memory_space<vmem>>, vector<8x128xf32>
    tpu.vector_store %arg6[%c0_14, %c0_15], %26 {strides = array<i32>} : memref<8x128xf32, #tpu.memory_space<vmem>>, vector<8x128xf32>,
    return
  }
  func.func @transform_0(%arg0: i32) -> (i32, i32) {
    %c0_i32 = arith.constant 0 : i32
    %c0_i32_0 = arith.constant 0 : i32
    return %arg0, %c0_i32 : i32, i32
  }
  func.func @transform_1(%arg0: i32) -> (i32, i32) {
    %c0_i32 = arith.constant 0 : i32
    %c0_i32_0 = arith.constant 0 : i32
    %c0_i32_1 = arith.constant 0 : i32
    return %c0_i32, %c0_i32_0 : i32, i32
  }
  func.func @transform_2(%arg0: i32) -> (i32, i32) {
    %c0_i32 = arith.constant 0 : i32
    %c0_i32_0 = arith.constant 0 : i32
    %c0_i32_1 = arith.constant 0 : i32
    return %c0_i32, %c0_i32_0 : i32, i32
  }
  func.func @transform_3(%arg0: i32) -> (i32, i32) {
    %c0_i32 = arith.constant 0 : i32
    %c0_i32_0 = arith.constant 0 : i32
    %c0_i32_1 = arith.constant 0 : i32
    return %c0_i32, %c0_i32_0 : i32, i32
  }
  func.func @transform_4(%arg0: i32) -> (i32, i32) {
    %c0_i32 = arith.constant 0 : i32
    %c0_i32_0 = arith.constant 0 : i32
    %c0_i32_1 = arith.constant 0 : i32
    return %c0_i32, %c0_i32_0 : i32, i32
  }
  func.func @transform_5(%arg0: i32) -> (i32, i32) {
    %c0_i32 = arith.constant 0 : i32
    %c0_i32_0 = arith.constant 0 : i32
    return %arg0, %c0_i32 : i32, i32
  }
}

</mosaic_0001>

<bundles_post_ra>
// kernel: tpu_custom_call.1
= control target key start
LH: loop header
LB: loop body
LE: loop exit
PB: predicated region body
PF: predicated region fallthrough
CT: control target
= control target key end

     0   :  { %10 = vsyncpa [#allocation3], 0  ;;  %s351_s0 = inlined_call_operand.hbm [shape: bf16[8,16], index: 0, kind: input, shape index: {}]   ;;  %s352_s1 = inlined_call_operand.hbm [shape: bf16[16,32], index: 1, kind: input, shape index: {}]   ;;  %s353_s2 = inlined_call_operand.vmem [shape: f32[1,32], index: 2, kind: input, shape index: {}]   ;;  %s354_s3 = inlined_call_operand.hbm [shape: bf16[32,128], index: 3, kind: input, shape index: {}]   ;;  %s355_s4 = inlined_call_operand.vmem [shape: f32[1,128], index: 4, kind: input, shape index: {}]   ;;  %s356_s5 = inlined_call_operand.hbm [shape: f32[8,128], index: 5, kind: output, shape index: {}]  }
   0x1   :  { %11 = vsyncpa [#allocation6], 0  ;;  %s28_s20 = sshll.u32 %s352_s1, 4  ;;  %s29_s20 = int_to_ptr.hbm [resolvable:$true] %s28_s20 }
   0x2   :  { %12 = vsyncpa [#allocation4], 0  ;;  %s297_s21 = smov [#allocation5]   ;;  %s18_s25 = sshll.u32 %s351_s0, 4  ;;  %s19_s25 = int_to_ptr.hbm [resolvable:$true] %s18_s25 }
   0x3   :  { %s30_s22 = sshll.u32 %s297_s21, 4  ;;  %s298_s26 = smov 64   ;;  %s31_s22 = int_to_ptr.vmem [resolvable:$true] %s30_s22 }
   0x4   :  { %s299_s27 = smov 4   ;;  %s300_s28 = smov [#allocation2]  }
   0x5   :  { %36 = dma.hbm_to_vmem [thread:$0]  %s29_s20, 128, %s31_s22, [#allocation6], %s298_s26, %s298_s26, %s299_s27  }
   0x6   :  { %s20_s29 = sshll.u32 %s300_s28, 4  ;;  %s43_s7 = sshll.u32 %s354_s3, 4  ;;  %s21_s29 = int_to_ptr.vmem [resolvable:$true] %s20_s29  ;;  %s44_s7 = int_to_ptr.hbm [resolvable:$true] %s43_s7 }
   0x7   :  { %23 = dma.hbm_to_vmem [thread:$0]  %s19_s25, 64, %s21_s29, [#allocation3]  }
   0x8   :  { %s301_s1 = smov [#allocation7]  }
   0x9   :  { %s45_s8 = sshll.u32 %s301_s1, 4  ;;  %s46_s8 = int_to_ptr.vmem [resolvable:$true] %s45_s8 }
   0xa   :  { %51 = dma.hbm_to_vmem [thread:$0]  %s44_s7, 256, %s46_s8, [#allocation6], %s298_s26, %s298_s26, %s299_s27  }
   0xb   :  { %291 = dma.done.wait [#allocation3], 64  }
   0xc   :  { %292 = vsyncadd [#allocation3], 4294967232 }
   0xd   :  { %293 = dma.done.wait [#allocation6], 384  }
   0xe   :  { %294 = vsyncadd [#allocation6], 4294966912  ;;  %v180_v0 = vld [vmem:[#allocation5] sm:$0xff]  ;;  %v67_v1 = vld [vmem:[#allocation2] sm:$0xf]  ;;  %vm80_vm0 = vcmask 130048  }
   0xf   :  { %91 = vmatpush.bf16.msra.mxu0 %v180_v0  ;;  %v182_v2 = vld [vmem:[#allocation7 + $0x8] sm:$0xff]  ;;  %v181_v3 = vld [vmem:[#allocation7] sm:$0xff]  ;;  %v189_v4 = vld [vmem:[%s353_s2] ss:$0 sm:$0xff]  ;;  %vm121_vm2 = vcmask 261120   ;;  %s302_s2 = smov [#allocation8]  }
  0x10   :  { %131 = vmatpush.bf16.msra.mxu1 %v182_v2  ;;  %v190_v11 = vld [vmem:[%s355_s4] ss:$0 sm:$0xff]  ;;  %s153_s11 = sshll.u32 %s302_s2, 4  ;;  %s155_s14 = sshll.u32 %s356_s5, 4  ;;  %s154_s11 = int_to_ptr.vmem [resolvable:$true] %s153_s11  ;;  %s156_s14 = int_to_ptr.hbm [resolvable:$true] %s155_s14 }
  0x12   :  { %170 = vmatmul.msk.bf16.vlgmr.msra.gmra.mxu0 %vm80_vm0, %v67_v1 }
  0x14   :  { %132 = vmatpush.bf16.msra.mxu1 %v181_v3 }
  0x8f   :  { %v93_v5 = vpop.f32.mrf.mxu0 }
  0x90   :  { %v94_v6 = vadd.f32 %v189_v4, %v93_v5 }
  0x92   :  { %vm97_vm1 = vcmp.gt.f32.partialorder %v94_v6, 0.0  ;;  %v98_v7 = vmul.f32 0.01, %v94_v6 }
  0x94   :  { %v99_v8 = vsel %vm97_vm1, %v94_v6, %v98_v7 }
  0x95   :  { %v100_v9 = vpack.c.bf16 %v99_v8, %v99_v8 }
  0x97   :  { %v95_v10 = vpop.f32.mrf.mxu0  ;;  %179 = vmatmul.msk.bf16.vlgmr.msra.gmra.mxu1 %vm121_vm2, %v100_v9 }
 0x114   :  { %v134_v12 = vpop.f32.mrf.mxu1 }
 0x115   :  { %v135_v13 = vadd.f32 %v190_v11, %v134_v12 }
 0x117   :  { %138 = vmax.xlane.f32.xlu0 %v135_v13 }
 0x11c   :  { %v136_v14 = vpop.f32.mrf.mxu1 }
 0x18a   :  { %v139_v15 = vpop.xlane.xlu0 %138 }
 0x18b   :  { %v140_v16 = vsub.f32 %v135_v13, %v139_v15 }
 0x18d   :  { %v141_v17 = vmul.f32 1.442695, %v140_v16 }
 0x18f   :  { %191 = vpow2.f32 %v141_v17 }
 0x195   :  { %v192_v18 = vpop.eup %191 }
 0x196   :  { %143 = vadd.xlane.f32.xlu0 %v192_v18 }
 0x209   :  { %v144_v19 = vpop.xlane.xlu0 %143 }
 0x20a   :  { %193 = vrcp.f32 %v144_v19 }
 0x210   :  { %v194_v20 = vpop.eup %193 }
 0x211   :  { %v146_v21 = vmul.f32 %v194_v20, %v192_v18 }
 0x213   :  { %147 = vst [vmem:[#allocation8] sm:$0xff] %v146_v21 }
 0x214   :  { %158 = dma.vmem_to_hbm [thread:$0]  %s154_s11, 128, %s156_s14, [#allocation4]  }
 0x215   :  { %295 = dma.done.wait [#allocation4], 128  }
 0x216   :  { %296 = vsyncadd [#allocation4], 4294967168 }
 0x217   :  { %163 = vsyncpa [#allocation3], 1 }
 0x218   :  { %164 = vsyncpa [#allocation6], 1 }
 0x219   :  { %165 = vsyncpa [#allocation4], 1 }

</bundles_post_ra>
